<compile_context>
chip_gen: v6e
topology: v6e:2x2x1
jax: 0.10.0
libtpu: 0.0.40
codegen_flags: <defaults>
</compile_context>

<pallas_src>
import functools

import jax
import jax.numpy as jnp
from jax import lax
from jax.experimental import pallas as pl
from jax.experimental.pallas import tpu as pltpu


def _round_up(x, m):
    return -(-x // m) * m


def _dot_proj_attn_kernel(v_ref, hp_ref, we_ref, wv_ref, o_ref, *, tb, seq_len):
    # v_ref:  (TB*L, E_pad)   flattened (batch, seq) rows of vectors_to_attend
    # hp_ref: (TB, A_pad)     hoisted hidden projection  h @ Wd^T + bw  (padded)
    # we_ref: (E_pad, A_pad)  encoder part of attn_w, pre-transposed, zero-padded
    # wv_ref: (1, A_pad)      attn_v weight row, zero-padded
    # o_ref:  (TB, E_pad)     context output (lane-dense)
    rows = tb * seq_len

    vf = v_ref[...]                                     # (rows, E_pad)
    hp = hp_ref[...].astype(jnp.float32)                # (TB, A_pad)
    wv = wv_ref[...].astype(jnp.float32)                # (1, A_pad)

    # --- energies: one big MXU pass + exact 0/1 broadcast of the hidden proj --
    r_ids = lax.broadcasted_iota(jnp.int32, (rows, tb), 0)
    j_ids = lax.broadcasted_iota(jnp.int32, (rows, tb), 1)
    row_onehot = jnp.logical_and(r_ids >= j_ids * seq_len,
                                 r_ids < (j_ids + 1) * seq_len).astype(jnp.float32)

    e = jnp.dot(vf, we_ref[...], preferred_element_type=jnp.float32)     # (rows, A_pad)
    e = e + jnp.dot(row_onehot, hp, preferred_element_type=jnp.float32)  # + hproj per row
    t = jnp.tanh(e)                                                      # (rows, A_pad)

    # --- scores (attn_v).  Its bias is a uniform shift -> cancels in softmax --
    s = jnp.sum(t * wv, axis=1, keepdims=True)          # (rows, 1), dense 128 lanes
    s_row = s.T                                         # (1, rows)  lane-major

    # --- per-batch masked softmax, lane-major ---------------------------------
    b_ids = lax.broadcasted_iota(jnp.int32, (tb, rows), 0)
    c_ids = lax.broadcasted_iota(jnp.int32, (tb, rows), 1)
    grp = jnp.logical_and(c_ids >= b_ids * seq_len,
                          c_ids < (b_ids + 1) * seq_len)                 # (TB, rows)

    neg = jnp.float32(-1e30)
    s2 = jnp.where(grp, s_row, neg)                     # (TB, rows)
    gmax = jnp.max(s2, axis=1, keepdims=True)           # (TB, 1)
    ex = jnp.where(grp, jnp.exp(s2 - gmax), 0.0)        # (TB, rows)  unnormalized weights
    gsum = jnp.sum(ex, axis=1, keepdims=True)           # (TB, 1)

    # --- context: one matmul over all TB batches (off-group weights are 0) ----
    ctx = jnp.dot(ex, vf, preferred_element_type=jnp.float32)            # (TB, E_pad)
    ctx = ctx * pl.reciprocal(gsum, approx=True)
    o_ref[...] = ctx.astype(o_ref.dtype)


def dot_projection_attention(hidden, vectors_to_attend, params, *, target_rows=256):
    """hidden: (B, D); vectors_to_attend: (L, B, E) -- PyTorch convention.

    Returns the context of shape (B, 1, E), matching the torch module.
    """
    L, B, E = vectors_to_attend.shape
    D = hidden.shape[1]
    A = params["w_bias"].shape[0]

    # ---- batch tile: amortize per-grid-step overhead, fill the MXU M dim -----
    tb = max(1, -(-target_rows // L))          # aim for ~256 rows per MXU pass
    if tb < B:
        tb = _round_up(tb, 8)                  # keep multi-step blocks sublane aligned
    if tb >= B:
        tb = B                                 # single step: blocks == full arrays
    b_pad = _round_up(B, tb)
    rows = tb * L

    # ---- lane padding: make every vreg / MXU pass / store lane-dense ---------
    a_pad = _round_up(A, 128)
    e_pad = _round_up(E, 128)

    # ---- hoist the hidden projection (one batched XLA matmul) ----------------
    w_full = params["w_weight"]                          # (A, E + D)
    we_t = w_full[:, :E].T                               # (E, A)   encoder part
    wd_t = w_full[:, E:].T                               # (D, A)   decoder part
    hproj = hidden @ wd_t + params["w_bias"][None, :]    # (B, A)   h @ Wd^T + bw
    hproj = jnp.pad(hproj.astype(jnp.float32), ((0, b_pad - B), (0, a_pad - A)))

    we_p = jnp.pad(we_t, ((0, e_pad - E), (0, a_pad - A)))            # (E_pad, A_pad)
    wv_row = jnp.pad(params["v_weight"], ((0, 0), (0, a_pad - A)))    # (1, A_pad)
    # params["v_bias"] shifts every score equally -> no effect on the softmax
    # weights or the context, so it is intentionally not passed to the kernel.

    # ---- batch-major, flattened, zero-padded vectors --------------------------
    # The (L,B,E)->(B,L,E) transpose + pad is one fused XLA copy; the kernel then
    # streams a plain lane-dense 2-D slab with a trivial 2-D BlockSpec.
    v = jnp.transpose(vectors_to_attend, (1, 0, 2))                   # (B, L, E)
    v = jnp.pad(v, ((0, b_pad - B), (0, 0), (0, e_pad - E)))
    v_flat = v.reshape(b_pad * L, e_pad)                              # (B_pad*L, E_pad)

    grid = (b_pad // tb,)

    out = pl.pallas_call(
        functools.partial(_dot_proj_attn_kernel, tb=tb, seq_len=L),
        out_shape=jax.ShapeDtypeStruct((b_pad, e_pad), jnp.float32),
        grid_spec=pltpu.PrefetchScalarGridSpec(
            num_scalar_prefetch=0,
            grid=grid,
            in_specs=[
                pl.BlockSpec((rows, e_pad), lambda b: (b, 0)),     # vectors tile
                pl.BlockSpec((tb, a_pad), lambda b: (b, 0)),       # hidden-proj tile
                pl.BlockSpec((e_pad, a_pad), lambda b: (0, 0)),    # We^T (resident)
                pl.BlockSpec((1, a_pad), lambda b: (0, 0)),        # wv row (resident)
            ],
            out_specs=pl.BlockSpec((tb, e_pad), lambda b: (b, 0)),
        ),
        compiler_params=pltpu.CompilerParams(
            dimension_semantics=("parallel",)),
    )(v_flat, hproj, we_p, wv_row)

    ctx = out[:B, :E].astype(hidden.dtype)               # (B, E)
    return ctx[:, None, :]                               # (B, 1, E)


def _reference(hidden, vectors_to_attend, params):
    """Pure-JAX reference mirroring the PyTorch forward exactly (incl. v_bias)."""
    L, B, E = vectors_to_attend.shape
    v = jnp.transpose(vectors_to_attend, (1, 0, 2))               # (B, L, E)
    h = jnp.broadcast_to(hidden[:, None, :], (B, L, hidden.shape[1]))
    cat = jnp.concatenate([v, h], axis=2)                         # (B, L, E+D)
    e = jnp.tanh(cat @ params["w_weight"].T + params["w_bias"])   # (B, L, A)
    s = e @ params["v_weight"].T + params["v_bias"]               # (B, L, 1)
    w = jax.nn.softmax(s, axis=1)                                 # (B, L, 1)
    w = jnp.transpose(w, (0, 2, 1))                               # (B, 1, L)
    return jnp.einsum("bol,ble->boe", w, v)                       # (B, 1, E)


if __name__ == "__main__":
    # Small, deterministic synthetic setup.
    B, L = 2, 8
    enc_hidden, dec_hidden, attn_size = 32, 32, 16

    key = jax.random.PRNGKey(0)
    k1, k2, k3, k4, k5, k6 = jax.random.split(key, 6)

    params = {
        "w_weight": jax.random.normal(k1, (attn_size, enc_hidden + dec_hidden),
                                      jnp.float32) * 0.1,
        "w_bias": jax.random.normal(k2, (attn_size,), jnp.float32) * 0.1,
        "v_weight": jax.random.normal(k3, (1, attn_size), jnp.float32) * 0.1,
        "v_bias": jax.random.normal(k4, (1,), jnp.float32) * 0.1,
    }

    hidden = jax.random.normal(k5, (B, dec_hidden), jnp.float32)
    vectors_to_attend = jax.random.normal(k6, (L, B, enc_hidden), jnp.float32)

    out = dot_projection_attention(hidden, vectors_to_attend, params)
    out = jax.block_until_ready(out)

    ref = _reference(hidden, vectors_to_attend, params)
    assert out.shape == (B, 1, enc_hidden), out.shape
    # Tolerance accounts for the approximate (EUP) reciprocal in the softmax.
    assert jnp.allclose(out, ref, atol=5e-3, rtol=5e-3), "mismatch vs reference"

    print("KERNEL_OK")
</pallas_src>

<mosaic_0001>
module attributes {stable_mosaic.version = 11 : i64} {
  func.func @_dot_proj_attn_kernel(%arg0: i32, %arg1: memref<16x128xf32, #tpu.memory_space<vmem>>, %arg2: memref<2x128xf32, #tpu.memory_space<vmem>>, %arg3: memref<128x128xf32, #tpu.memory_space<vmem>>, %arg4: memref<1x128xf32, #tpu.memory_space<vmem>>, %arg5: memref<2x128xf32, #tpu.memory_space<vmem>>) attributes {dimension_semantics = [#tpu.dimension_semantics<parallel>], iteration_bounds = array<i64: 1>, scalar_prefetch = 0 : i64, scratch_operands = 0 : i64, tpu.core_type = #tpu.core_type<tc>, window_params = [{transform_indices = @transform_0, window_bounds = array<i64: 16, 128>}, {transform_indices = @transform_1, window_bounds = array<i64: 2, 128>}, {pipeline_mode = #tpu.pipeline_mode<synchronous>, transform_indices = @transform_2, window_bounds = array<i64: 128, 128>}, {pipeline_mode = #tpu.pipeline_mode<synchronous>, transform_indices = @transform_3, window_bounds = array<i64: 1, 128>}, {transform_indices = @transform_4, window_bounds = array<i64: 2, 128>}]} {
    %c0 = arith.constant 0 : index
    %c0_0 = arith.constant 0 : index
    %0 = vector.load %arg1[%c0, %c0_0] : memref<16x128xf32, #tpu.memory_space<vmem>>, vector<16x128xf32>
    %c0_1 = arith.constant 0 : index
    %c0_2 = arith.constant 0 : index
    %1 = vector.load %arg2[%c0_1, %c0_2] : memref<2x128xf32, #tpu.memory_space<vmem>>, vector<2x128xf32>
    %c0_3 = arith.constant 0 : index
    %c0_4 = arith.constant 0 : index
    %2 = vector.load %arg4[%c0_3, %c0_4] : memref<1x128xf32, #tpu.memory_space<vmem>>, vector<1x128xf32>
    %3 = tpu.iota {dimensions = array<i32: 0>} : vector<16x2xi32>
    %4 = tpu.iota {dimensions = array<i32: 1>} : vector<16x2xi32>
    %c8_i32 = arith.constant 8 : i32
    %5 = vector.broadcast %c8_i32 : i32 to vector<16x2xi32>
    %6 = arith.muli %4, %5 : vector<16x2xi32>
    %7 = arith.cmpi sge, %3, %6 : vector<16x2xi32>
    %c1_i32 = arith.constant 1 : i32
    %8 = vector.broadcast %c1_i32 : i32 to vector<16x2xi32>
    %9 = arith.addi %4, %8 : vector<16x2xi32>
    %c8_i32_5 = arith.constant 8 : i32
    %10 = vector.broadcast %c8_i32_5 : i32 to vector<16x2xi32>
    %11 = arith.muli %9, %10 : vector<16x2xi32>
    %12 = arith.cmpi slt, %3, %11 : vector<16x2xi32>
    %13 = arith.andi %7, %12 : vector<16x2xi1>
    %14 = arith.extui %13 : vector<16x2xi1> to vector<16x2xi32>
    %15 = arith.sitofp %14 : vector<16x2xi32> to vector<16x2xf32>
    %c0_6 = arith.constant 0 : index
    %c0_7 = arith.constant 0 : index
    %16 = vector.load %arg3[%c0_6, %c0_7] : memref<128x128xf32, #tpu.memory_space<vmem>>, vector<128x128xf32>
    %cst = arith.constant dense<0.000000e+00> : vector<16x128xf32>
    %17 = tpu.matmul %0, %16, %cst {dimension_numbers = #tpu.dot_dimension_numbers<[1], [0], [0], [1], [0, 0, 1, 1], [], []>} : vector<16x128xf32>, vector<128x128xf32>, vector<16x128xf32> -> vector<16x128xf32>
    %cst_8 = arith.constant dense<0.000000e+00> : vector<16x128xf32>
    %18 = tpu.matmul %15, %1, %cst_8 {dimension_numbers = #tpu.dot_dimension_numbers<[1], [0], [0], [1], [0, 0, 1, 1], [], []>} : vector<16x2xf32>, vector<2x128xf32>, vector<16x128xf32> -> vector<16x128xf32>
    %19 = arith.addf %17, %18 : vector<16x128xf32>
    %20 = math.tanh %19 : vector<16x128xf32>
    %21 = vector.broadcast %2 : vector<1x128xf32> to vector<16x128xf32>
    %22 = arith.mulf %20, %21 : vector<16x128xf32>
    %cst_9 = arith.constant dense<0.000000e+00> : vector<16xf32>
    %23 = vector.multi_reduction <add>, %22, %cst_9 [1] : vector<16x128xf32> to vector<16xf32>
    %24 = vector.shape_cast %23 : vector<16xf32> to vector<16x1xf32>
    %25 = tpu.transpose %24, [1, 0] : vector<16x1xf32> -> vector<1x16xf32>
    %26 = tpu.iota {dimensions = array<i32: 0>} : vector<2x16xi32>
    %27 = tpu.iota {dimensions = array<i32: 1>} : vector<2x16xi32>
    %c8_i32_10 = arith.constant 8 : i32
    %28 = vector.broadcast %c8_i32_10 : i32 to vector<2x16xi32>
    %29 = arith.muli %26, %28 : vector<2x16xi32>
    %30 = arith.cmpi sge, %27, %29 : vector<2x16xi32>
    %c1_i32_11 = arith.constant 1 : i32
    %31 = vector.broadcast %c1_i32_11 : i32 to vector<2x16xi32>
    %32 = arith.addi %26, %31 : vector<2x16xi32>
    %c8_i32_12 = arith.constant 8 : i32
    %33 = vector.broadcast %c8_i32_12 : i32 to vector<2x16xi32>
    %34 = arith.muli %32, %33 : vector<2x16xi32>
    %35 = arith.cmpi slt, %27, %34 : vector<2x16xi32>
    %36 = arith.andi %30, %35 : vector<2x16xi1>
    %cst_13 = arith.constant -1.000000e+30 : f32
    %37 = vector.shape_cast %25 : vector<1x16xf32> to vector<1x16xf32>
    %38 = vector.broadcast %37 : vector<1x16xf32> to vector<2x16xf32>
    %39 = vector.broadcast %cst_13 : f32 to vector<2x16xf32>
    %40 = arith.select %36, %38, %39 : vector<2x16xi1>, vector<2x16xf32>
    %cst_14 = arith.constant dense<0xFF800000> : vector<2xf32>
    %41 = vector.multi_reduction <maximumf>, %40, %cst_14 [1] : vector<2x16xf32> to vector<2xf32>
    %42 = vector.shape_cast %41 : vector<2xf32> to vector<2x1xf32>
    %43 = vector.broadcast %42 : vector<2x1xf32> to vector<2x16xf32>
    %44 = arith.subf %40, %43 : vector<2x16xf32>
    %45 = math.exp %44 : vector<2x16xf32>
    %cst_15 = arith.constant 0.000000e+00 : f32
    %46 = vector.broadcast %cst_15 : f32 to vector<2x16xf32>
    %47 = arith.select %36, %45, %46 : vector<2x16xi1>, vector<2x16xf32>
    %cst_16 = arith.constant dense<0.000000e+00> : vector<2xf32>
    %48 = vector.multi_reduction <add>, %47, %cst_16 [1] : vector<2x16xf32> to vector<2xf32>
    %49 = vector.shape_cast %48 : vector<2xf32> to vector<2x1xf32>
    %cst_17 = arith.constant dense<0.000000e+00> : vector<2x128xf32>
    %50 = tpu.matmul %47, %0, %cst_17 {dimension_numbers = #tpu.dot_dimension_numbers<[1], [0], [0], [1], [0, 0, 1, 1], [], []>} : vector<2x16xf32>, vector<16x128xf32>, vector<2x128xf32> -> vector<2x128xf32>
    %51 = tpu.reciprocal %49 {approx = true} : vector<2x1xf32> -> vector<2x1xf32>
    %52 = vector.broadcast %51 : vector<2x1xf32> to vector<2x128xf32>
    %53 = arith.mulf %50, %52 : vector<2x128xf32>
    %c0_18 = arith.constant 0 : index
    %c0_19 = arith.constant 0 : index
    %54 = vector.load %arg5[%c0_18, %c0_19] : memref<2x128xf32, #tpu.memory_space<vmem>>, vector<2x128xf32>
    tpu.vector_store %arg5[%c0_18, %c0_19], %53 {strides = array<i32>} : memref<2x128xf32, #tpu.memory_space<vmem>>, vector<2x128xf32>,
    return
  }
  func.func @transform_0(%arg0: i32) -> (i32, i32) {
    %c0_i32 = arith.constant 0 : i32
    %c0_i32_0 = arith.constant 0 : i32
    return %arg0, %c0_i32 : i32, i32
  }
  func.func @transform_1(%arg0: i32) -> (i32, i32) {
    %c0_i32 = arith.constant 0 : i32
    %c0_i32_0 = arith.constant 0 : i32
    return %arg0, %c0_i32 : i32, i32
  }
  func.func @transform_2(%arg0: i32) -> (i32, i32) {
    %c0_i32 = arith.constant 0 : i32
    %c0_i32_0 = arith.constant 0 : i32
    %c0_i32_1 = arith.constant 0 : i32
    return %c0_i32, %c0_i32_0 : i32, i32
  }
  func.func @transform_3(%arg0: i32) -> (i32, i32) {
    %c0_i32 = arith.constant 0 : i32
    %c0_i32_0 = arith.constant 0 : i32
    %c0_i32_1 = arith.constant 0 : i32
    return %c0_i32, %c0_i32_0 : i32, i32
  }
  func.func @transform_4(%arg0: i32) -> (i32, i32) {
    %c0_i32 = arith.constant 0 : i32
    %c0_i32_0 = arith.constant 0 : i32
    return %arg0, %c0_i32 : i32, i32
  }
}

</mosaic_0001>

<bundles_post_ra>
// kernel: tpu_custom_call.1
= control target key start
LH: loop header
LB: loop body
LE: loop exit
PB: predicated region body
PF: predicated region fallthrough
CT: control target
= control target key end

     0   :  { %9 = vsyncpa [#allocation3], 0  ;;  %s702_s0 = inlined_call_operand.hbm [shape: f32[16,128], index: 0, kind: input, shape index: {}]   ;;  %s703_s1 = inlined_call_operand.hbm [shape: f32[2,128], index: 1, kind: input, shape index: {}]   ;;  %s704_s2 = inlined_call_operand.hbm [shape: f32[128,128], index: 2, kind: input, shape index: {}]   ;;  %s705_s3 = inlined_call_operand.vmem [shape: f32[1,128], index: 3, kind: input, shape index: {}]   ;;  %s706_s4 = inlined_call_operand.hbm [shape: f32[2,128], index: 4, kind: output, shape index: {}]  }
   0x1   :  { %10 = vsyncpa [#allocation6], 0 }
   0x2   :  { %11 = vsyncpa [#allocation4], 0  ;;  %s597_s15 = smov [#allocation5]   ;;  %s598_s17 = smov [#allocation2]  }
   0x3   :  { %s30_s16 = sshll.u32 %s597_s15, 4  ;;  %s17_s18 = sshll.u32 %s598_s17, 4  ;;  %s31_s16 = int_to_ptr.vmem [resolvable:$true] %s30_s16  ;;  %s18_s18 = int_to_ptr.vmem [resolvable:$true] %s17_s18 }
   0x4   :  { %s519_s19 = scalar_lea.vmem %s31_s16, 32  ;;  %p524_p1 = scmp.lt.s32.totalorder %s31_s16, %s31_s16 }
   0x5   :  { %p520_p0 = scmp.ne.s32.totalorder %s31_s16, %s519_s19  ;;  %p525_p2 = scmp.lt.s32.totalorder %s519_s19, %s519_s19 }
   0x7   :  { %p526_p3 = por %p525_p2, %p524_p1 }
   0x9   :  { %p527_p4 = pnand %p526_p3, %p520_p0 }
   0xb   :  { %530 = shalt.err (!%p527_p4)
}
   0xc   :  { %33 = dma.hbm_to_vmem [thread:$0]  %s703_s1, 32, %s31_s16, [#allocation6]  }
   0xd   :  { %s539_s22 = scalar_lea.vmem %s18_s18, 256  ;;  %p544_p6 = scmp.lt.s32.totalorder %s18_s18, %s18_s18 }
   0xe   :  { %p540_p5 = scmp.ne.s32.totalorder %s18_s18, %s539_s22  ;;  %p545_p7 = scmp.lt.s32.totalorder %s539_s22, %s539_s22 }
  0x10   :  { %p546_p8 = por %p545_p7, %p544_p6 }
  0x12   :  { %p547_p9 = pnand %p546_p8, %p540_p5 }
  0x14   :  { %550 = shalt.err (!%p547_p9)
}
  0x15   :  { %s599_s23 = smov 128   ;;  %s600_s24 = smov 8  }
  0x16   :  { %23 = dma.hbm_to_vmem [thread:$0]  %s702_s0, 256, %s18_s18, [#allocation3], %s599_s23, %s599_s23, %s600_s24  }
  0x17   :  { %s601_s27 = smov [#allocation7]  }
  0x18   :  { %s39_s28 = sshll.u32 %s601_s27, 4  ;;  %s40_s28 = int_to_ptr.vmem [resolvable:$true] %s39_s28 }
  0x19   :  { %s559_s29 = scalar_lea.vmem %s40_s28, 2048  ;;  %p564_p11 = scmp.lt.s32.totalorder %s40_s28, %s40_s28 }
  0x1a   :  { %p560_p10 = scmp.ne.s32.totalorder %s40_s28, %s559_s29  ;;  %p565_p12 = scmp.lt.s32.totalorder %s559_s29, %s559_s29 }
  0x1c   :  { %p566_p13 = por %p565_p12, %p564_p11 }
  0x1e   :  { %p567_p0 = pnand %p566_p13, %p560_p10 }
  0x20   :  { %570 = shalt.err (!%p567_p0)
}
  0x21   :  { %45 = dma.hbm_to_vmem [thread:$0]  %s704_s2, 2048, %s40_s28, [#allocation6], %s599_s23, %s599_s23, %s600_s24  }
  0x22   :  { %591 = dma.done.wait [#allocation3], 256  }
  0x23   :  { %592 = vsyncadd [#allocation3], 4294967040 }
  0x24   :  { %593 = dma.done.wait [#allocation6], 2080  }
  0x25   :  { %594 = vsyncadd [#allocation6], 4294965216  ;;  %v61_v0 = vlaneseq  ;;  %v94_v7 = vld [vmem:[#allocation7 + $0x78] sm:$0xff]  ;;  %v93_v8 = vld [vmem:[#allocation7 + $0x70] sm:$0xff]  ;;  %vm102_vm0 = vcmask 1041408   ;;  %vm95_vm5 = vcmask 15360  }
  0x26   :  { %453 = vmatprep.subr.mxu1 %v94_v7  ;;  %v92_v9 = vld [vmem:[#allocation7 + $0x68] sm:$0xff]  ;;  %v91_v14 = vld [vmem:[#allocation7 + $0x60] sm:$0xff]  ;;  %v59_v15 = vld [vmem:[#allocation5] sm:$0x3]  ;;  %v602_v17 = vmov 0.0   ;;  %vm313_vm11 = vcmask 123904  }
  0x27   :  { %v639_v1 = vshrl.u32 %v61_v0, 7  ;;  %v641_v2 = vand.u32 127, %v61_v0  ;;  %454 = vmatpush3.msra.mxu1 %v94_v7  ;;  %448 = vmatprep.subr.msk.mxu0 %vm102_vm0, %v59_v15  ;;  %v90_v16 = vld [vmem:[#allocation7 + $0x58] sm:$0xff]  ;;  %v57_v19 = vld [vmem:[#allocation2] sm:$0xff]  ;;  %v87_v24 = vld [vmem:[#allocation7 + $0x40] sm:$0xff]  ;;  %vm603_vm12 = vmmov 0  }
  0x28   :  { %455 = vmatprep.subr.mxu1 %v93_v8  ;;  %449 = vmatpush3.msk.msra.mxu0 %vm102_vm0, %v59_v15  ;;  %v89_v21 = vld [vmem:[#allocation7 + $0x50] sm:$0xff]  ;;  %v88_v22 = vld [vmem:[#allocation7 + $0x48] sm:$0xff]  ;;  %v86_v25 = vld [vmem:[#allocation7 + $0x38] sm:$0xff]  ;;  %vm324_vm13 = vcmask 130048  }
  0x29   :  { %v69_v3 = vadd.s32 1, %v641_v2  ;;  %v66_v4 = vmul.u32 8, %v641_v2  ;;  %v63_v6 = vadd.s32 8, %v639_v1  ;;  %456 = vmatpush3.msra.mxu1 %v93_v8  ;;  %485 = vmatprep.mubr.f32.mxu1 %v57_v19  ;;  %v58_v23 = vld [vmem:[#allocation2 + $0x8] sm:$0xff]  ;;  %v84_v27 = vld [vmem:[#allocation7 + $0x28] sm:$0xff]  ;;  %v83_v28 = vld [vmem:[#allocation7 + $0x20] sm:$0xff] }
  0x2a   :  { %457 = vmatprep.subr.mxu1 %v92_v9  ;;  %488 = vmatprep.subr.mxu0 %v602_v17  ;;  %v85_v26 = vld [vmem:[#allocation7 + $0x30] sm:$0xff]  ;;  %v82_v29 = vld [vmem:[#allocation7 + $0x18] sm:$0xff]  ;;  %v80_v31 = vld [vmem:[#allocation7 + $0x8] sm:$0xff]  ;;  %v304_v46 = vadd.s32 1, %v639_v1  ;;  %v302_v47 = vmul.u32 8, %v639_v1  ;;  %v310_v49 = vsub.s32 0, %v639_v1 }
  0x2b   :  { %v70_v5 = vmul.u32 8, %v69_v3  ;;  %vm647_vm1 = vcmp.ge.s32.totalorder %v639_v1, %v66_v4  ;;  %vm656_vm3 = vcmp.ge.s32.totalorder %v63_v6, %v66_v4  ;;  %458 = vmatpush3.msra.mxu1 %v92_v9  ;;  %v81_v30 = vld [vmem:[#allocation7 + $0x10] sm:$0xff]  ;;  %v79_v32 = vld [vmem:[#allocation7] sm:$0xff]  ;;  %v422_v40 = vld [vmem:[%s705_s3] ss:$0 sm:$0xff]  ;;  %s604_s3 = smov [#allocation8]  }
  0x2c   :  { %459 = vmatprep.subr.mxu1 %v91_v14  ;;  %v305_v48 = vmul.u32 8, %v304_v46  ;;  %vm685_vm8 = vcmp.ge.s32.totalorder %v641_v2, %v302_v47  ;;  %s407_s5 = sshll.u32 %s604_s3, 4  ;;  %s408_s5 = int_to_ptr.vmem [resolvable:$true] %s407_s5 }
  0x2d   :  { %vm652_vm2 = vcmp.lt.s32.totalorder %v639_v1, %v70_v5  ;;  %vm660_vm4 = vcmp.lt.s32.totalorder %v63_v6, %v70_v5  ;;  %460 = vmatpush3.msra.mxu1 %v91_v14  ;;  %s571_s6 = scalar_lea.vmem %s408_s5, 32  ;;  %p576_p2 = scmp.lt.s32.totalorder %s408_s5, %s408_s5 }
  0x2e   :  { %vm73_vm6 = vmand %vm647_vm1, %vm652_vm2  ;;  %461 = vmatprep.subr.mxu1 %v90_v16  ;;  %vm690_vm9 = vcmp.lt.s32.totalorder %v641_v2, %v305_v48  ;;  %p572_p1 = scmp.ne.s32.totalorder %s408_s5, %s571_s6  ;;  %p577_p3 = scmp.lt.s32.totalorder %s571_s6, %s571_s6 }
  0x2f   :  { %v417_v18 = vsel %vm73_vm6, 1.0, %v602_v17  ;;  %vm74_vm7 = vmand %vm656_vm3, %vm660_vm4  ;;  %462 = vmatpush3.msra.mxu1 %v90_v16 }
  0x30   :  { %450 = vmatprep.mubr.msk.f32.mxu0 %vm95_vm5, %v417_v18  ;;  %v418_v20 = vsel %vm74_vm7, 1.0, %v602_v17  ;;  %463 = vmatprep.subr.mxu1 %v89_v21  ;;  %vm307_vm10 = vmand %vm685_vm8, %vm690_vm9  ;;  %p578_p4 = por %p577_p3, %p576_p2 }
  0x31   :  { %451 = vmatmul.mubr.msk.f32.vlgmr.msra.gmra.mxu0 %vm95_vm5, %v418_v20  ;;  %464 = vmatpush3.msra.mxu1 %v89_v21 }
  0x32   :  { %489 = vmatpush3.msra.mxu0 %v58_v23  ;;  %465 = vmatprep.subr.mxu1 %v88_v22  ;;  %p579_p5 = pnand %p578_p4, %p572_p1 }
  0x33   :  { %490 = vmatprep.subr.mxu0 %v602_v17  ;;  %466 = vmatpush3.msra.mxu1 %v88_v22 }
  0x34   :  { %491 = vmatpush3.msra.mxu0 %v57_v19  ;;  %467 = vmatprep.subr.mxu1 %v87_v24 }
  0x35   :  { %468 = vmatpush3.msra.mxu1 %v87_v24  ;;  %492 = vmatprep.mubr.msk.f32.mxu0 %vm603_vm12, %v602_v17 }
  0x36   :  { %469 = vmatprep.subr.mxu1 %v86_v25 }
  0x37   :  { %470 = vmatpush3.msra.mxu1 %v86_v25 }
  0x38   :  { %471 = vmatprep.subr.mxu1 %v85_v26 }
  0x39   :  { %472 = vmatpush3.msra.mxu1 %v85_v26 }
  0x3a   :  { %473 = vmatprep.subr.mxu1 %v84_v27 }
  0x3b   :  { %474 = vmatpush3.msra.mxu1 %v84_v27 }
  0x3c   :  { %475 = vmatprep.subr.mxu1 %v83_v28 }
  0x3d   :  { %476 = vmatpush3.msra.mxu1 %v83_v28 }
  0x3e   :  { %477 = vmatprep.subr.mxu1 %v82_v29 }
  0x3f   :  { %478 = vmatpush3.msra.mxu1 %v82_v29 }
  0x40   :  { %479 = vmatprep.subr.mxu1 %v81_v30 }
  0x41   :  { %480 = vmatpush3.msra.mxu1 %v81_v30 }
  0x42   :  { %481 = vmatprep.subr.mxu1 %v80_v31 }
  0x43   :  { %482 = vmatpush3.msra.mxu1 %v80_v31 }
  0x44   :  { %483 = vmatprep.subr.mxu1 %v79_v32 }
  0x45   :  { %484 = vmatpush3.msra.mxu1 %v79_v32 }
  0x46   :  { %486 = vmatmul.mubr.f32.vlgmr.msra.gmra.mxu1 %v58_v23 }
  0xf1   :  { %v452_v33 = vpop.f32.mrf.mxu0 }
  0xf3   :  { %v172_v35 = vpop.f32.mrf.mxu0 }
 0x106   :  { %v487_v34 = vpop.f32.mrf.mxu1 }
 0x107   :  { %v253_v37 = vadd.f32 %v487_v34, %v452_v33 }
 0x108   :  { %v247_v36 = vpop.f32.mrf.mxu1 }
 0x109   :  { %v248_v38 = vadd.f32 %v247_v36, %v172_v35 }
 0x10b   :  { %503 = vtanh.f32 %v248_v38 }
 0x10c   :  { %505 = vtanh.f32 %v253_v37 }
 0x118   :  { %v504_v39 = vpop.eup %503 }
 0x119   :  { %v264_v41 = vmul.f32 %v504_v39, %v422_v40  ;;  %v506_v42 = vpop.eup %505 }
 0x11a   :  { %v265_v43 = vmul.f32 %v506_v42, %v422_v40 }
 0x11b   :  { %266 = vadd.xlane.f32.xlu0 %v264_v41 }
 0x11f   :  { %268 = vadd.xlane.f32.xlu0 %v265_v43 }
 0x1a4   :  { %v267_v44 = vpop.xlane.xlu0 %266 }
 0x1a5   :  { %270 = vxpose.xlu1.b32.start [1/2] (short) (narrow) %v267_v44, 8 }
 0x1a8   :  { %v269_v45 = vpop.xlane.xlu0 %268 }
 0x1a9   :  { %271 = vxpose.xlu1.b32.end [2/2] (short) (narrow) %v269_v45, 8 }
 0x221   :  { %v286_v52 = vpop.trf.xlu1 }
 0x222   :  { %v311_v53 = vrot.slane %v286_v52, %v310_v49 }
 0x224   :  { %v312_v54 = vsel %vm307_vm10, %v311_v53, -1e+30 }
 0x225   :  { %v314_v55 = vsel %vm313_vm11, %v312_v54, -inf }
 0x226   :  { %315 = vmax.xlane.f32.xlu0 %v314_v55 }
 0x2af   :  { %v316_v56 = vpop.xlane.xlu0 %315 }
 0x2b0   :  { %v317_v57 = vsub.f32 %v312_v54, %v316_v56 }
 0x2b2   :  { %v318_v58 = vmul.f32 1.442695, %v317_v57 }
 0x2b4   :  { %507 = vpow2.f32 %v318_v58 }
 0x2c1   :  { %v508_v59 = vpop.eup %507 }
 0x2c2   :  { %v320_v60 = vsel %vm307_vm10, %v508_v59, 0.0 }
 0x2c3   :  { %493 = vmatmul.mubr.msk.f32.vlgmr.msra.gmra.mxu0 %vm324_vm13, %v320_v60  ;;  %v321_v61 = vsel %vm313_vm11, %v320_v60, 0.0 }
 0x2c4   :  { %322 = vadd.xlane.f32.xlu1 %v321_v61 }
 0x34d   :  { %v323_v62 = vpop.xlane.xlu1 %322 }
 0x34e   :  { %509 = vrcp.f32 %v323_v62 }
 0x35b   :  { %v510_v63 = vpop.eup %509 }
 0x383   :  { %v394_v0 = vpop.f32.mrf.mxu0 }
 0x384   :  { %v399_v1 = vmul.f32 %v510_v63, %v394_v0 }
 0x385   :  { %v494_v2 = vpop.f32.mrf.mxu0 }
 0x386   :  { %400 = vst [vmem:[#allocation8] sm:$0x3] %v399_v1 }
 0x387   :  { %582 = shalt.err (!%p579_p5)
}
 0x388   :  { %410 = dma.vmem_to_hbm [thread:$0]  %s408_s5, 32, %s706_s4, [#allocation4]  }
 0x389   :  { %595 = dma.done.wait [#allocation4], 32  }
 0x38a   :  { %596 = vsyncadd [#allocation4], 4294967264 }
 0x38b   :  { %414 = vsyncpa [#allocation3], 1 }
 0x38c   :  { %415 = vsyncpa [#allocation6], 1 }
 0x38d   :  { %416 = vsyncpa [#allocation4], 1 }

</bundles_post_ra>
